<compile_context>
chip_gen: v7x
topology: tpu7x:2x2x1
jax: 0.10.0
libtpu: 0.0.40
codegen_flags: <defaults>
</compile_context>

<pallas_src>
import math

import jax
import jax.numpy as jnp
from jax import lax
from jax.experimental import pallas as pl
from jax.experimental.pallas import tpu as pltpu


def _round_up(x, m):
    return ((x + m - 1) // m) * m


def _downsample_matmul_kernel(x_ref, w_ref, b_ref, o_ref):
    """One (batch, M-tile) block per grid step.

    x_ref: (tm, 9*C_in)   im2col rows for tm output pixels
    w_ref: (9*C_in, C_out) flattened conv weights (kh, kw, c_in)-major
    b_ref: (1, C_out)      bias
    o_ref: (tm, C_out)     flat output rows
    """
    acc = jnp.dot(x_ref[...], w_ref[...], preferred_element_type=jnp.float32)
    acc = acc + b_ref[...].astype(jnp.float32)
    o_ref[...] = acc.astype(o_ref.dtype)


def downsample(x_nchw, w_hwio, bias):
    """Pallas equivalent of nn.Conv2d(C, C, kernel_size=3, stride=2, padding=1).

    x_nchw: (N, C, H, W)
    w_hwio: (3, 3, C_in, C_out)
    bias:   (C_out,)
    returns (N, C_out, H_out, W_out) with H_out = (H + 2 - 3)//2 + 1
    """
    n, c, h, w = x_nchw.shape
    kh, kw, c_in, c_out = w_hwio.shape
    assert (kh, kw) == (3, 3) and c_in == c

    h_out = (h + 2 - 3) // 2 + 1
    w_out = (w + 2 - 3) // 2 + 1
    m_total = h_out * w_out
    k9 = 9 * c_in
    itemsize = jnp.dtype(x_nchw.dtype).itemsize

    # --- Wrapper glue (HBM passes; not the hot path for C >= ~64) -------------
    # TODO(synk): accept NHWC upstream / fuse the pad+gather to cut these passes.
    x_nhwc = jnp.transpose(x_nchw, (0, 2, 3, 1))                 # (N, H, W, C)
    x_pad = jnp.pad(x_nhwc, ((0, 0), (1, 1), (1, 1), (0, 0)))    # conv padding=1

    # im2col: tap (kh,kw) of output pixel (i,j) reads padded (2i+kh, 2j+kw).
    taps = []
    for dkh in range(3):
        for dkw in range(3):
            taps.append(x_pad[:, dkh:dkh + 2 * h_out:2, dkw:dkw + 2 * w_out:2, :])
    x_col = jnp.concatenate(taps, axis=-1)                        # (N, Ho, Wo, 9C)
    x_col = x_col.reshape(n, m_total, k9)

    # --- M tiling --------------------------------------------------------------
    tm = min(512, _round_up(m_total, 8))
    # Keep the (double-buffered) x block a few MiB so it fits v7x's 64 MiB VMEM.
    while tm > 8 and tm * k9 * itemsize > (6 << 20):
        tm //= 2
    tm = max(8, (tm // 8) * 8)
    m_pad = _round_up(m_total, tm)
    if m_pad != m_total:
        x_col = jnp.pad(x_col, ((0, 0), (0, m_pad - m_total), (0, 0)))

    w_col = w_hwio.reshape(k9, c_out)          # (kh, kw, c_in)-major matches taps
    bias2d = bias.reshape(1, c_out)

    flops = 2 * n * m_total * k9 * c_out
    bytes_accessed = (x_col.size + w_col.size + bias2d.size) * itemsize \
        + n * m_pad * c_out * itemsize

    out_flat = pl.pallas_call(
        _downsample_matmul_kernel,
        out_shape=jax.ShapeDtypeStruct((n, m_pad, c_out), x_nchw.dtype),
        grid_spec=pl.GridSpec(
            grid=(n, m_pad // tm),
            in_specs=[
                pl.BlockSpec((None, tm, k9), lambda b, m: (b, m, 0)),
                pl.BlockSpec((k9, c_out), lambda b, m: (0, 0)),
                pl.BlockSpec((1, c_out), lambda b, m: (0, 0)),
            ],
            out_specs=pl.BlockSpec((None, tm, c_out), lambda b, m: (b, m, 0)),
        ),
        compiler_params=pltpu.CompilerParams(
            dimension_semantics=("parallel", "parallel"),
            # Above the 16/32 MiB default scoped limits, within every chip's VMEM.
            vmem_limit_bytes=64 * 1024 * 1024,
        ),
        cost_estimate=pl.CostEstimate(
            flops=flops, transcendentals=0, bytes_accessed=bytes_accessed),
    )(x_col, w_col, bias2d)

    out_nhwc = out_flat[:, :m_total, :].reshape(n, h_out, w_out, c_out)
    # NHWC -> NCHW to match the PyTorch module's output convention.
    return jnp.transpose(out_nhwc, (0, 3, 1, 2))


if __name__ == "__main__":
    # Small, deterministic example consistent with DownSample(input_channels=4).
    N, C, H, W = 2, 4, 16, 16

    key = jax.random.PRNGKey(0)
    kx, kw_, kb = jax.random.split(key, 3)

    x = jax.random.normal(kx, (N, C, H, W), dtype=jnp.float32)

    # Deterministic "Conv2d-like" init (uniform with kaiming-style bound).
    fan_in = C * 3 * 3
    bound = 1.0 / math.sqrt(fan_in)
    w_hwio = jax.random.uniform(kw_, (3, 3, C, C), jnp.float32, -bound, bound)
    b = jax.random.uniform(kb, (C,), jnp.float32, -bound, bound)

    out = downsample(x, w_hwio, b)
    out = jax.block_until_ready(out)

    # Reference check against XLA's conv (same semantics as torch Conv2d).
    w_oihw = jnp.transpose(w_hwio, (3, 2, 0, 1))  # (C_out, C_in, kh, kw)
    ref = lax.conv_general_dilated(
        x, w_oihw, window_strides=(2, 2), padding=((1, 1), (1, 1)),
        dimension_numbers=("NCHW", "OIHW", "NCHW"),
    ) + b[None, :, None, None]

    assert out.shape == (N, C, 8, 8), out.shape
    assert jnp.allclose(out, ref, atol=1e-5, rtol=1e-5), "mismatch vs reference conv"

    print("KERNEL_OK")
</pallas_src>

<mosaic_0001>
module attributes {stable_mosaic.version = 11 : i64} {
  func.func @_downsample_matmul_kernel(%arg0: i32, %arg1: i32, %arg2: memref<1x64x36xf32, #tpu.memory_space<vmem>>, %arg3: memref<36x4xf32, #tpu.memory_space<vmem>>, %arg4: memref<1x4xf32, #tpu.memory_space<vmem>>, %arg5: memref<1x64x4xf32, #tpu.memory_space<vmem>>) attributes {dimension_semantics = [#tpu.dimension_semantics<parallel>, #tpu.dimension_semantics<parallel>], iteration_bounds = array<i64: 2, 1>, scalar_prefetch = 0 : i64, scratch_operands = 0 : i64, tpu.core_type = #tpu.core_type<tc>, window_params = [{transform_indices = @transform_0, window_bounds = array<i64: 1, 64, 36>}, {pipeline_mode = #tpu.pipeline_mode<synchronous>, transform_indices = @transform_1, window_bounds = array<i64: 36, 4>}, {pipeline_mode = #tpu.pipeline_mode<synchronous>, transform_indices = @transform_2, window_bounds = array<i64: 1, 4>}, {transform_indices = @transform_3, window_bounds = array<i64: 1, 64, 4>}]} {
    %c0 = arith.constant 0 : index
    %c0_0 = arith.constant 0 : index
    %c0_1 = arith.constant 0 : index
    %0 = vector.load %arg2[%c0, %c0_0, %c0_1] : memref<1x64x36xf32, #tpu.memory_space<vmem>>, vector<1x64x36xf32>
    %1 = vector.shape_cast %0 : vector<1x64x36xf32> to vector<64x36xf32>
    %c0_2 = arith.constant 0 : index
    %c0_3 = arith.constant 0 : index
    %2 = vector.load %arg3[%c0_2, %c0_3] : memref<36x4xf32, #tpu.memory_space<vmem>>, vector<36x4xf32>
    %cst = arith.constant dense<0.000000e+00> : vector<64x4xf32>
    %3 = tpu.matmul %1, %2, %cst {dimension_numbers = #tpu.dot_dimension_numbers<[1], [0], [0], [1], [0, 0, 1, 1], [], []>} : vector<64x36xf32>, vector<36x4xf32>, vector<64x4xf32> -> vector<64x4xf32>
    %c0_4 = arith.constant 0 : index
    %c0_5 = arith.constant 0 : index
    %4 = vector.load %arg4[%c0_4, %c0_5] : memref<1x4xf32, #tpu.memory_space<vmem>>, vector<1x4xf32>
    %5 = vector.broadcast %4 : vector<1x4xf32> to vector<64x4xf32>
    %6 = arith.addf %3, %5 : vector<64x4xf32>
    %c0_6 = arith.constant 0 : index
    %c0_7 = arith.constant 0 : index
    %c0_8 = arith.constant 0 : index
    %7 = vector.load %arg5[%c0_6, %c0_7, %c0_8] : memref<1x64x4xf32, #tpu.memory_space<vmem>>, vector<1x64x4xf32>
    %8 = vector.shape_cast %7 : vector<1x64x4xf32> to vector<64x4xf32>
    %9 = vector.shape_cast %6 : vector<64x4xf32> to vector<1x64x4xf32>
    tpu.vector_store %arg5[%c0_6, %c0_7, %c0_8], %9 {strides = array<i32>} : memref<1x64x4xf32, #tpu.memory_space<vmem>>, vector<1x64x4xf32>,
    return
  }
  func.func @transform_0(%arg0: i32, %arg1: i32) -> (i32, i32, i32) {
    %c0_i32 = arith.constant 0 : i32
    %c0_i32_0 = arith.constant 0 : i32
    return %arg0, %arg1, %c0_i32 : i32, i32, i32
  }
  func.func @transform_1(%arg0: i32, %arg1: i32) -> (i32, i32) {
    %c0_i32 = arith.constant 0 : i32
    %c0_i32_0 = arith.constant 0 : i32
    %c0_i32_1 = arith.constant 0 : i32
    return %c0_i32, %c0_i32_0 : i32, i32
  }
  func.func @transform_2(%arg0: i32, %arg1: i32) -> (i32, i32) {
    %c0_i32 = arith.constant 0 : i32
    %c0_i32_0 = arith.constant 0 : i32
    %c0_i32_1 = arith.constant 0 : i32
    return %c0_i32, %c0_i32_0 : i32, i32
  }
  func.func @transform_3(%arg0: i32, %arg1: i32) -> (i32, i32, i32) {
    %c0_i32 = arith.constant 0 : i32
    %c0_i32_0 = arith.constant 0 : i32
    return %arg0, %arg1, %c0_i32 : i32, i32, i32
  }
}

</mosaic_0001>

<bundles_post_ra>
// kernel: tpu_custom_call.1
= control target key start
LH: loop header
LB: loop body
LE: loop exit
PB: predicated region body
PF: predicated region fallthrough
CT: control target
= control target key end

     0   :  { %8 = vsyncpa [#allocation3], 0  ;;  %s1182_s0 = inlined_call_operand.hbm [shape: f32[2,64,36], index: 0, kind: input, shape index: {}]   ;;  %s1183_s1 = inlined_call_operand.hbm [shape: f32[36,4], index: 1, kind: input, shape index: {}]   ;;  %s1184_s2 = inlined_call_operand.hbm [shape: f32[1,4], index: 2, kind: input, shape index: {}]   ;;  %s1185_s3 = inlined_call_operand.hbm [shape: f32[2,64,4], index: 3, kind: output, shape index: {}]  }
   0x1   :  { %10 = vsyncpa [#allocation3 + $0x1], 0 }
   0x2   :  { %11 = vsyncpa [#allocation6], 0 }
   0x3   :  { %12 = vsyncpa [#allocation4], 0 }
   0x4   :  { %14 = vsyncpa [#allocation4 + $0x1], 0  ;;  %s890_s12 = smov 0   ;;  %s892_s13 = smov 0  }
   0x5   :  { %s894_s14 = smov 0   ;;  %s896_s15 = smov 0  }
   0x6   :  { %s898_s16 = smov 0   ;;  %s900_s17 = smov 0  }
   0x7 LB: > { %s521_s18 = sadd.s32 4294967295, %s860_s17   ;;  %s522_s19 = sadd.s32 4294967294, %s860_s17   ;;  %s860_s17 = sphi %s900_s17, %s20_s17   ;;  %s856_s16 = sphi %s898_s16, %s1207_s16   ;;  %s852_s15 = sphi %s896_s15, %s1206_s15   ;;  %s848_s14 = sphi %s894_s14, %s1205_s14   ;;  %s844_s13 = sphi %s892_s13, %s1204_s13   ;;  %s840_s12 = sphi %s890_s12, %s1203_s12  }
   0x8   : > { %p54_p0 = scmp.ne.s32.totalorder %s844_s13, %s840_s12  ;;  %p924_p1 = scmp.eq.s32.totalorder %s521_s18, 0 }
   0x9   : > { %p928_p2 = scmp.eq.s32.totalorder %s521_s18, 1  ;;  %p128_p3 = scmp.eq.s32.totalorder %s522_s19, 1 }
   0xa   : > { %s1190_s20 = scalar_select %p924_p1, 1, 0 }
   0xb   : > { %p934_p4 = por %p924_p1, %p54_p0  ;;  %p523_p5 = scmp.ge.s32.totalorder %s860_s17, 1 }
   0xc   : > { %p939_p6 = por %p128_p3, %p54_p0  ;;  %p135_p7 = scmp.lt.s32.totalorder %s860_s17, 3 }
   0xd   : > { %s1192_s22 = scalar_select %p934_p4, 1, 0 }
   0xe   : > { %s1193_s23 = scalar_select %p939_p6, 1, 0 }
   0xf   : > { %p944_p8 = pnand %p523_p5, %p135_p7  ;;  %s862_s25 = smov [#allocation5]  }
  0x10   : > { %s147_s26 = sshll.u32 %s862_s25, 4  ;;  %s863_s28 = smov [#allocation7]   ;;  %s948_s26 = int_to_ptr.vmem [resolvable:$true] %s147_s26 }
  0x11   : > { %p613_p9 = pneg %p944_p8  ;;  %s161_s29 = sshll.u32 %s863_s28, 4  ;;  %s959_s29 = int_to_ptr.vmem [resolvable:$true] %s161_s29 }
  0x12   : > { %s688_s5 = scalar_lea.hbm %s1183_s1, 640 }
  0x13   : > { %p955_p11 = pnand %p613_p9, %p924_p1  ;;  %p689_p12 = scmp.ne.s32.totalorder %s1183_s1, %s688_s5 }
  0x14   : > { %p695_p5 = scmp.lt.u32.totalorder %s688_s5, %s1183_s1 }
  0x15   : > { %p690_p13 = pneg %p955_p11 }
  0x17   : > { %p691_p0 = pnand %p690_p13, %p689_p12 }
  0x19   : > { %p692_p3 = pneg %p691_p0 }
  0x1b   : > { %p697_p7 = pnand %p695_p5, %p692_p3 }
  0x1d   : > { %700 = shalt.err (!%p697_p7)
}
  0x1e   : > { %s701_s10 = scalar_lea.vmem %s948_s26, 640  ;;  %p709_p1 = scmp.lt.s32.totalorder %s948_s26, %s948_s26 }
  0x1f   : > { %p702_p9 = scmp.ne.s32.totalorder %s948_s26, %s701_s10  ;;  %p710_p12 = scmp.lt.s32.totalorder %s701_s10, %s701_s10 }
  0x21   : > { %p704_p10 = pnand %p702_p9, %p690_p13  ;;  %p711_p0 = por %p710_p12, %p709_p1 }
  0x23   : > { %p705_p6 = pneg %p704_p10 }
  0x25   : > { %p712_p4 = pnand %p711_p0, %p705_p6 }
  0x27   : > { %715 = shalt.err (!%p712_p4)
}
  0x28   : > { %s864_s11 = smov 128   ;;  %s865_s18 = smov 8  }
  0x29   : > { %616 = dma.hbm_to_vmem [thread:$0]  (!%p955_p11), %s1183_s1, 640, %s948_s26, [#allocation6], %s864_s11, %s864_s11, %s865_s18  }
  0x2a   : > { %s716_s4 = scalar_lea.hbm %s1184_s2, 16 }
  0x2b   : > { %p717_p1 = scmp.ne.s32.totalorder %s1184_s2, %s716_s4  ;;  %p723_p10 = scmp.lt.u32.totalorder %s716_s4, %s1184_s2 }
  0x2d   : > { %p719_p4 = pnand %p717_p1, %p690_p13 }
  0x2f   : > { %p720_p6 = pneg %p719_p4 }
  0x31   : > { %p725_p3 = pnand %p723_p10, %p720_p6 }
  0x33   : > { %728 = shalt.err (!%p725_p3)
}
  0x34   : > { %s729_s26 = scalar_lea.vmem %s959_s29, 16  ;;  %s736_s9 = scalar_lea.vmem %s959_s29, 32 }
  0x35   : > { %p730_p5 = scmp.ne.s32.totalorder %s959_s29, %s729_s26  ;;  %p737_p12 = scmp.lt.s32.totalorder %s959_s29, %s959_s29 }
  0x36   : > { %p738_p0 = scmp.lt.s32.totalorder %s736_s9, %s729_s26 }
  0x37   : > { %p732_p7 = pnand %p730_p5, %p690_p13 }
  0x38   : > { %p739_p1 = por %p738_p0, %p737_p12 }
  0x39   : > { %p733_p9 = pneg %p732_p7 }
  0x3b   : > { %p740_p4 = pnand %p739_p1, %p733_p9 }
  0x3d   : > { %743 = shalt.err (!%p740_p4)
}
  0x3e   : > { %619 = dma.hbm_to_vmem [thread:$0]  (!%p955_p11), %s1184_s2, 16, %s959_s29, [#allocation6]  }
  0x3f   : > { %s32_s25 = sadd.s32 1, %s856_s16  ;;  %s41_s28 = sadd.s32 1, %s848_s14 }
  0x40   : > { %p34_p13 = scmp.ge.s32.totalorder %s32_s25, 2  ;;  %p48_p6 = scmp.ne.s32.totalorder %s848_s14, %s844_s13 }
  0x41   : > { %p49_p10 = scmp.eq.s32.totalorder %s860_s17, 0  ;;  %p630_p3 = scmp.lt.s32.totalorder %s860_s17, 2 }
  0x42   : > { %s1209_s25 = smov (%p34_p13, %s32_s25), 0  ;;  %p1027_p7 = por %p928_p2, %p48_p6 }
  0x43   : > { %p50_p5 = por %p49_p10, %p48_p6  ;;  %s36_s30 = ssub.s32 %s856_s16, %s1209_s25 }
  0x44   : > { %s1196_s27 = scalar_select %p1027_p7, 1, 0 }
  0x45   : > { %s172_s4 = sand.u32 1, %s848_s14   ;;  %p39_p9 = scmp.eq.s32.totalorder %s36_s30, 0 }
  0x46   : > { %s527_s29 = sshll.u32 %s172_s4, 6  ;;  %s550_s5 = sshll.u32 %s856_s16, 10 }
  0x47   : > { %s1036_s6 = scalar_select %p39_p9, %s848_s14, %s41_s28  }
  0x48   : > { %s1041_s26 = scalar_lea.hbm %s1182_s0, %s550_s5  ;;  %s176_s21 = scalar_lea.vmem [#allocation2], %s527_s29 }
  0x49   : > { %s185_s9 = sshll.u32 %s176_s21, 4  ;;  %p1045_p2 = pnand %p630_p3, %p50_p5  ;;  %s1049_s9 = int_to_ptr.vmem [resolvable:$true] %s185_s9 }
  0x4a   : > { %s1051_s19 = scalar_lea.sflag [#allocation3], %s172_s4  ;;  %s744_s28 = scalar_lea.hbm %s1041_s26, 1024 }
  0x4b   : > { %p745_p11 = scmp.ne.s32.totalorder %s1041_s26, %s744_s28  ;;  %p746_p12 = pneg %p1045_p2 }
  0x4c   : > { %s749_s5 = scalar_lea.hbm %s1182_s0, 2048  ;;  %p750_p4 = scmp.lt.u32.totalorder %s1041_s26, %s1182_s0 }
  0x4d   : > { %p747_p0 = pnand %p746_p12, %p745_p11  ;;  %p751_p13 = scmp.lt.u32.totalorder %s749_s5, %s744_s28 }
  0x4e   : > { %p753_p10 = scmp.lt.u32.totalorder %s744_s28, %s1041_s26 }
  0x4f   : > { %p748_p1 = pneg %p747_p0  ;;  %p752_p6 = por %p751_p13, %p750_p4 }
  0x51   : > { %p754_p3 = por %p753_p10, %p752_p6 }
  0x53   : > { %p755_p5 = pnand %p754_p3, %p748_p1 }
  0x55   : > { %758 = shalt.err (!%p755_p5)
}
  0x56   : > { %s759_s4 = scalar_lea.vmem %s1049_s9, 1024  ;;  %s866_s21 = smov [#allocation2]  }
  0x57   : > { %p760_p9 = scmp.ne.s32.totalorder %s1049_s9, %s759_s4  ;;  %s764_s30 = sshll.u32 %s866_s21, 4  ;;  %s765_s30 = int_to_ptr.vmem [resolvable:$false] %s764_s30 }
  0x58   : > { %s766_s29 = scalar_lea.vmem %s765_s30, 2048  ;;  %p767_p7 = scmp.lt.s32.totalorder %s1049_s9, %s765_s30 }
  0x59   : > { %p762_p11 = pnand %p760_p9, %p746_p12  ;;  %p768_p4 = scmp.lt.s32.totalorder %s766_s29, %s759_s4 }
  0x5b   : > { %p763_p0 = pneg %p762_p11  ;;  %p769_p13 = por %p768_p4, %p767_p7 }
  0x5d   : > { %p770_p6 = pnand %p769_p13, %p763_p0 }
  0x5f   : > { %773 = shalt.err (!%p770_p6)
}
  0x60   : > { %623 = dma.hbm_to_vmem [thread:$0]  (!%p1045_p2), %s1041_s26, 1024, %s1049_s9, %s1051_s19, %s864_s11, %s864_s11, %s865_s18  }
  0x61   : > { %197 = sbr.rel (%p944_p8) target bundleno = 355 (0x163), region = 32  ;;  %s1085_s28 = sand.u32 (!%p944_p8), 1, %s844_s13  }
  0x62   : > { %s531_s5 = sshll.u32 (!%p944_p8), %s1085_s28, 6  ;;  %s200_s7 = scalar_lea.sflag (!%p944_p8), [#allocation3], %s1085_s28 }
  0x63   : > { %s1091_s10 = scalar_lea.vmem (!%p944_p8), [#allocation2], %s531_s5  ;;  %p1198_p7 = scmp.ne.s32.totalorder (!%p944_p8), %s1192_s22, 0 }
  0x68   : > { %827 = dma.done.wait (%p1198_p7), %s200_s7, 1024  }
  0x69   : > { %829 = vsyncadd (%p1198_p7), %s200_s7, 4294966272  ;;  %p1199_p2 = scmp.ne.s32.totalorder %s1190_s20, 0 }
  0x6b   : > { %831 = dma.done.wait (%p1199_p2), [#allocation6], 656  }
  0x6c   : > { %833 = vsyncadd (%p1199_p2), [#allocation6], 4294966640  ;;  %vm256_vm0 = vcmask 293888   ;;  %v244_v0 = vld [vmem:[#allocation5] sm:$0xff]  ;;  %v245_v1 = vld [vmem:[#allocation5 + $0x8] sm:$0xff]  ;;  %vm281_vm1 = vcmask 1043456  }
  0x6d   : > { %v246_v2 = vld [vmem:[#allocation5 + $0x10] sm:$0xff]  ;;  %v587_v3 = vpack.c.bf16 %v245_v1, %v244_v0  ;;  %v247_v4 = vld [vmem:[#allocation5 + $0x18] sm:$0xff]  ;;  %v236_v5 = vld [vmem:[%s1091_s10] sm:$0xff]  ;;  %vm390_vm2 = vcmask 31744   ;;  %s551_s20 = sshll.u32 %s852_s15, 10  ;;  %s233_s22 = scalar_lea.vmem [#allocation8], %s531_s5 }
  0x6e   : > { %v591_v6 = vpack.c.bf16 %v247_v4, %v246_v2  ;;  %575 = vmatprep.mubr.msk.f32.mxu0 %vm256_vm0, %v236_v5  ;;  %v240_v7 = vld [vmem:[%s1091_s10 + $0x20] sm:$0xff]  ;;  %v237_v9 = vld [vmem:[%s1091_s10 + $0x8] sm:$0xff]  ;;  %v238_v11 = vld [vmem:[%s1091_s10 + $0x10] sm:$0xff]  ;;  %s415_s24 = sshll.u32 %s233_s22, 4  ;;  %s1127_s18 = scalar_lea.hbm %s1185_s3, %s551_s20  ;;  %s1129_s24 = int_to_ptr.vmem [resolvable:$true] %s415_s24 }
  0x6f   : > { %588 = vmatprep.subr.bf16.mxu0 %v587_v3  ;;  %595 = vmatprep.subr.bf16.mxu1 %v587_v3  ;;  %v248_v8 = vld [vmem:[#allocation5 + $0x20] sm:$0xf]  ;;  %v241_v10 = vld [vmem:[%s1091_s10 + $0x28] sm:$0xff]  ;;  %v242_v12 = vld [vmem:[%s1091_s10 + $0x30] sm:$0xff]  ;;  %s400_s26 = scalar_lea.sflag [#allocation4], %s1085_s28  ;;  %s774_s9 = scalar_lea.vmem %s1129_s24, 1024 }
  0x70   : > { %590 = vmatpush3.bf16.msra.mxu0 %v587_v3  ;;  %598 = vmatpush3.bf16.msra.mxu1 %v587_v3  ;;  %v239_v13 = vld [vmem:[%s1091_s10 + $0x18] sm:$0xff]  ;;  %v535_v15 = vld [vmem:[#allocation7] ss:$0 sm:$0xff]  ;;  %p775_p8 = scmp.ne.s32.totalorder %s1129_s24, %s774_s9  ;;  %p1200_p12 = scmp.ne.s32.totalorder %s1196_s27, 0 }
  0x71   : > { %592 = vmatprep.subr.bf16.mxu0 %v591_v6  ;;  %596 = vmatprep.subr.bf16.mxu1 %v591_v6  ;;  %v243_v14 = vld [vmem:[%s1091_s10 + $0x38] sm:$0xff]  ;;  %s867_s19 = smov [#allocation8]  }
  0x72   : > { %581 = vmatprep.mubr.msk.f32.mxu1 %vm256_vm0, %v240_v7  ;;  %p776_p1 = pnand %p775_p8, %p1200_p12  ;;  %s778_s8 = sshll.u32 %s867_s19, 4  ;;  %s779_s8 = int_to_ptr.vmem [resolvable:$false] %s778_s8 }
  0x73   : > { %s780_s4 = scalar_lea.vmem %s779_s8, 2048  ;;  %p781_p3 = scmp.lt.s32.totalorder %s1129_s24, %s779_s8 }
  0x74   : > { %594 = vmatpush3.bf16.msra.mxu0 %v591_v6  ;;  %599 = vmatpush3.bf16.msra.mxu1 %v591_v6  ;;  %p777_p10 = pneg %p776_p1  ;;  %p782_p5 = scmp.lt.s32.totalorder %s780_s4, %s774_s9 }
  0x75   : > { %573 = vmatprep.subr.msk.mxu0 %vm281_vm1, %v248_v8  ;;  %597 = vmatprep.subr.msk.mxu1 %vm281_vm1, %v248_v8 }
  0x76   : > { %p783_p9 = por %p782_p5, %p781_p3 }
  0x78   : > { %574 = vmatpush3.msk.msra.mxu0 %vm281_vm1, %v248_v8  ;;  %600 = vmatpush3.msk.msra.mxu1 %vm281_vm1, %v248_v8  ;;  %p784_p11 = pnand %p783_p9, %p777_p10 }
  0x79   : > { %576 = vmatmul.mubr.msk.f32.vlgmr.msra.gmra.mrb[0].mxu0 %vm256_vm0, %v237_v9  ;;  %582 = vmatmul.mubr.msk.f32.vlgmr.msra.gmra.mrb[0].mxu1 %vm256_vm0, %v241_v10 }
  0x7a   : > { %578 = vmatprep.mubr.msk.f32.mxu0 %vm256_vm0, %v238_v11  ;;  %584 = vmatprep.mubr.msk.f32.mxu1 %vm256_vm0, %v242_v12 }
  0x7d   : > { %579 = vmatmul.mubr.msk.f32.gmra.mrb[2].mxu0 %vm256_vm0, %v239_v13  ;;  %585 = vmatmul.mubr.msk.f32.gmra.mrb[2].mxu1 %vm256_vm0, %v243_v14 }
 0x14c   : > { %v577_v16 = vpop.f32.mrb[0].mxu0  ;;  %v583_v17 = vpop.f32.mrb[0].mxu1 }
 0x14d   : > { %v357_v18 = vadd.f32 %v577_v16, %v535_v15  ;;  %v377_v19 = vadd.f32 %v583_v17, %v535_v15  ;;  %v351_v20 = vpop.f32.mrb[1].mxu0  ;;  %v371_v21 = vpop.f32.mrb[1].mxu1 }
 0x14e   : > { %v352_v22 = vadd.f32 %v535_v15, %v351_v20  ;;  %v372_v23 = vadd.f32 %v535_v15, %v371_v21 }
 0x14f   : > { %392 = vst.msk [vmem:[%s233_s22 + $0x8] sm:$0xff] %vm390_vm2, %v357_v18  ;;  %396 = vst.msk [vmem:[%s233_s22 + $0x28] sm:$0xff] %vm390_vm2, %v377_v19 }
 0x150   : > { %391 = vst.msk [vmem:[%s233_s22] sm:$0xff] %vm390_vm2, %v352_v22  ;;  %395 = vst.msk [vmem:[%s233_s22 + $0x20] sm:$0xff] %vm390_vm2, %v372_v23  ;;  %v580_v24 = vpop.f32.mrb[2].mxu0  ;;  %v586_v25 = vpop.f32.mrb[2].mxu1 }
 0x151   : > { %v367_v26 = vadd.f32 %v580_v24, %v535_v15  ;;  %v387_v27 = vadd.f32 %v586_v25, %v535_v15  ;;  %v361_v28 = vpop.f32.mrb[3].mxu0  ;;  %v381_v29 = vpop.f32.mrb[3].mxu1 }
 0x152   : > { %v362_v30 = vadd.f32 %v535_v15, %v361_v28  ;;  %v382_v31 = vadd.f32 %v535_v15, %v381_v29 }
 0x153   : > { %394 = vst.msk [vmem:[%s233_s22 + $0x18] sm:$0xff] %vm390_vm2, %v367_v26  ;;  %398 = vst.msk [vmem:[%s233_s22 + $0x38] sm:$0xff] %vm390_vm2, %v387_v27 }
 0x154   : > { %393 = vst.msk [vmem:[%s233_s22 + $0x10] sm:$0xff] %vm390_vm2, %v362_v30  ;;  %397 = vst.msk [vmem:[%s233_s22 + $0x30] sm:$0xff] %vm390_vm2, %v382_v31 }
 0x155   : > { %787 = shalt.err (!%p784_p11)
}
 0x156   : > { %s788_s21 = scalar_lea.hbm %s1127_s18, 1024  ;;  %s792_s5 = scalar_lea.hbm %s1185_s3, 2048 }
 0x157   : > { %p789_p0 = scmp.ne.s32.totalorder %s1127_s18, %s788_s21  ;;  %p793_p6 = scmp.lt.u32.totalorder %s1127_s18, %s1185_s3 }
 0x158   : > { %p794_p7 = scmp.lt.u32.totalorder %s792_s5, %s788_s21  ;;  %p796_p8 = scmp.lt.u32.totalorder %s788_s21, %s1127_s18 }
 0x159   : > { %p790_p4 = pnand %p789_p0, %p1200_p12 }
 0x15a   : > { %p795_p2 = por %p794_p7, %p793_p6 }
 0x15b   : > { %p791_p13 = pneg %p790_p4 }
 0x15c   : > { %p797_p1 = por %p796_p8, %p795_p2 }
 0x15e   : > { %p798_p10 = pnand %p797_p1, %p791_p13 }
 0x160   : > { %801 = shalt.err (!%p798_p10)
}
 0x161   : > { %s868_s20 = smov 128   ;;  %s869_s22 = smov 8  }
 0x162   : > { %611 = dma.vmem_to_hbm [thread:$0]  (%p1200_p12), %s1129_s24, 1024, %s1127_s18, %s400_s26, %s868_s20, %s868_s20, %s869_s22  }
 0x163 PF: > { %s430_s15 = sand.u32 1, %s840_s12   ;;  %p1201_p3 = scmp.ne.s32.totalorder %s1193_s23, 0 }
 0x164   : > { %p1202_p5 = scmp.ge.s32.totalorder %s860_s17, 2  ;;  %s431_s11 = scalar_lea.sflag [#allocation4], %s430_s15 }
 0x166   : > { %p625_p9 = pnand %p1202_p5, %p1201_p3 }
 0x168   : > { %835 = dma.done.wait (!%p625_p9), %s431_s11, 1024  }
 0x169   : > { %837 = vsyncadd (!%p625_p9), %s431_s11, 4294966272  ;;  %s20_s17 = sadd.s32 1, %s860_s17   ;;  %s1203_s12 = smov %s844_s13 }
 0x16a   : > { %p17_p11 = scmp.ge.s32.totalorder %s20_s17, 4   ;;  %s1204_s13 = smov %s848_s14 }
 0x16b   : > { %s1205_s14 = smov %s1036_s6  ;;  %s1206_s15 = smov %s856_s16 }
 0x16c   : > { %s1207_s16 = smov %s1209_s25  ;;  %19 = sbr.rel (!%p17_p11) target bundleno = 7 (0x7), region = 85 }
 0x173   :  { %436 = vsyncpa [#allocation3], 1 }
 0x174   :  { %438 = vsyncpa [#allocation3 + $0x1], 1 }
 0x175   :  { %439 = vsyncpa [#allocation6], 1 }
 0x176   :  { %440 = vsyncpa [#allocation4], 1 }
 0x177   :  { %442 = vsyncpa [#allocation4 + $0x1], 1 }

</bundles_post_ra>
